<compile_context>
chip_gen: v5e
topology: v5e:2x2
jax: 0.10.0
libtpu: 0.0.40
codegen_flags: <defaults>
</compile_context>

<pallas_src>
import functools

import jax
import jax.numpy as jnp
from jax.experimental import pallas as pl
from jax.experimental.pallas import tpu as pltpu

_LANE = 128      # vreg lane width (last dim)
_SUBLANE = 8     # vreg sublane width (second-to-last dim)
_VMEM_LIMIT = 32 * 1024 * 1024          # explicit scoped-VMEM limit (safe on v5e/v6e/v7x)
_VMEM_BUDGET = 24 * 1024 * 1024         # headroom below the limit for tile sizing


def _round_up(n, m):
    return ((n + m - 1) // m) * m


def _pad2(a, rows, cols):
    r, c = a.shape
    return jnp.pad(a, ((0, rows - r), (0, cols - c)))


def autoencoder_fused_kernel(x_ref, w12_ref, b12_ref, w34_ref, b34_ref, o_ref):
    """One batch tile:  relu(x @ W12 + b12) @ W34 + b34  (2 MXU matmuls)."""
    x = x_ref[...]

    # Encoder (folded pair) + ReLU, f32 accumulation on the MXU.
    h = jnp.dot(x, w12_ref[...], preferred_element_type=jnp.float32) + b12_ref[...]
    h = jnp.maximum(h, 0.0)

    # Decoder (folded pair), f32 accumulation.
    y = jnp.dot(h.astype(w34_ref.dtype), w34_ref[...],
                preferred_element_type=jnp.float32) + b34_ref[...]

    o_ref[...] = y.astype(o_ref.dtype)


def _pick_batch_tile(batch, in_p, hid_p, itemsize, cap=1024):
    """Largest multiple-of-8 batch tile (<= cap) whose working set fits VMEM budget.

    Per-tile traffic: x tile (double-buffered, compute dtype), out tile
    (double-buffered, f32) and the f32 hidden activation; the padded weights and
    biases are resident once (constant index_map -> single buffer).
    """
    resident = (in_p * hid_p + hid_p * in_p) * itemsize + (hid_p + in_p) * 4
    per_row = (2 * in_p * itemsize        # x tile, double-buffered
               + 2 * in_p * 4             # out tile (f32), double-buffered
               + hid_p * 4 + in_p * 4)    # in-kernel f32 h and y
    avail = max(_VMEM_BUDGET - resident, per_row * _SUBLANE)
    tile = min(cap, max(_SUBLANE, (avail // per_row) // _SUBLANE * _SUBLANE))
    if batch <= tile:
        return _round_up(max(batch, 1), _SUBLANE)
    return tile


def autoencoder_forward(x, params, *, batch_tile=None, compute_dtype=jnp.bfloat16):
    """x: (B, input_dim) float32. params: dict of (in,out) weights and (1,out) biases."""
    B, input_dim = x.shape
    f32 = jnp.float32

    w1, b1 = params["w1"].astype(f32), params["b1"].astype(f32)
    w2, b2 = params["w2"].astype(f32), params["b2"].astype(f32)
    w3, b3 = params["w3"].astype(f32), params["b3"].astype(f32)
    w4, b4 = params["w4"].astype(f32), params["b4"].astype(f32)

    # Fold the activation-free Linear pairs (exact: no nonlinearity in between).
    w12 = w1 @ w2
    b12 = b1 @ w2 + b2
    w34 = w3 @ w4
    b34 = b3 @ w4 + b4

    hid = w12.shape[1]                       # encoding_dim // 2
    in_p = _round_up(input_dim, _LANE)       # lane-dense feature dims
    hid_p = _round_up(hid, _LANE)
    itemsize = jnp.dtype(compute_dtype).itemsize

    if batch_tile is None:
        batch_tile = _pick_batch_tile(B, in_p, hid_p, itemsize)
    assert batch_tile % _SUBLANE == 0, "batch_tile must be a multiple of 8"
    B_pad = _round_up(B, batch_tile)
    grid = (B_pad // batch_tile,)

    # Zero-padding is exact: padded x columns hit zero weight rows, padded hidden
    # units get zero weight columns + zero bias (relu(0)=0), padded outputs are
    # zero and sliced off below.
    x_p = _pad2(x.astype(f32), B_pad, in_p).astype(compute_dtype)
    w12_p = _pad2(w12, in_p, hid_p).astype(compute_dtype)
    w34_p = _pad2(w34, hid_p, in_p).astype(compute_dtype)
    b12_p = _pad2(b12, 1, hid_p)             # biases stay f32 (added post-accumulate)
    b34_p = _pad2(b34, 1, in_p)

    bytes_accessed = (x_p.size * itemsize                 # x in
                      + B_pad * in_p * 4                  # out (f32)
                      + (w12_p.size + w34_p.size) * itemsize
                      + (b12_p.size + b34_p.size) * 4)
    cost = pl.CostEstimate(
        flops=2 * B_pad * (in_p * hid_p + hid_p * in_p),
        transcendentals=0,
        bytes_accessed=bytes_accessed,
    )

    def replicated(shape):
        # Full-array block, same block index every grid step -> stays VMEM-resident.
        return pl.BlockSpec(shape, lambda i: (0,) * len(shape))

    out = pl.pallas_call(
        autoencoder_fused_kernel,
        out_shape=jax.ShapeDtypeStruct((B_pad, in_p), f32),
        grid_spec=pltpu.PrefetchScalarGridSpec(
            num_scalar_prefetch=0,
            grid=grid,
            in_specs=[
                pl.BlockSpec((batch_tile, in_p), lambda i: (i, 0)),   # x tile
                replicated(w12_p.shape), replicated(b12_p.shape),
                replicated(w34_p.shape), replicated(b34_p.shape),
            ],
            out_specs=pl.BlockSpec((batch_tile, in_p), lambda i: (i, 0)),
        ),
        compiler_params=pltpu.CompilerParams(
            dimension_semantics=("parallel",),        # batch grid shards across TCs (v7x)
            vmem_limit_bytes=_VMEM_LIMIT,
        ),
        cost_estimate=cost,
    )(x_p, w12_p, b12_p, w34_p, b34_p)

    return out[:B, :input_dim]


def init_params(key, input_dim, encoding_dim):
    """Init mimicking torch.nn.Linear default (U(-1/sqrt(in), 1/sqrt(in))).

    Weights stored as (in_features, out_features) — PyTorch W.T — biases (1, out).
    """
    half = encoding_dim // 2
    dims = [
        (input_dim, encoding_dim),   # encoder Linear 1
        (encoding_dim, half),        # encoder Linear 2
        (half, encoding_dim),        # decoder Linear 1
        (encoding_dim, input_dim),   # decoder Linear 2
    ]
    params = {}
    keys = jax.random.split(key, 2 * len(dims))
    for idx, (fan_in, fan_out) in enumerate(dims):
        bound = 1.0 / (fan_in ** 0.5)
        w = jax.random.uniform(keys[2 * idx], (fan_in, fan_out),
                               jnp.float32, minval=-bound, maxval=bound)
        b = jax.random.uniform(keys[2 * idx + 1], (1, fan_out),
                               jnp.float32, minval=-bound, maxval=bound)
        params[f"w{idx + 1}"] = w
        params[f"b{idx + 1}"] = b
    return params


def reference_forward(x, p):
    """Unfused f32 reference matching the PyTorch forward."""
    h = x @ p["w1"] + p["b1"]
    h = h @ p["w2"] + p["b2"]
    h = jnp.maximum(h, 0.0)
    h = h @ p["w3"] + p["b3"]
    return h @ p["w4"] + p["b4"]


if __name__ == "__main__":
    # Small shapes consistent with the module: batch=8, input_dim=64, encoding_dim=32
    batch, input_dim, encoding_dim = 8, 64, 32

    key = jax.random.PRNGKey(0)
    k_x, k_p = jax.random.split(key)
    x = jax.random.normal(k_x, (batch, input_dim), dtype=jnp.float32)
    params = init_params(k_p, input_dim, encoding_dim)

    ref = reference_forward(x, params)

    # 1) f32 compute path — tight check vs. unfused reference.
    fwd_f32 = jax.jit(functools.partial(autoencoder_forward,
                                        compute_dtype=jnp.float32))
    out_f32 = jax.block_until_ready(fwd_f32(x, params))
    assert out_f32.shape == (batch, input_dim)
    assert jnp.allclose(out_f32, ref, atol=1e-4, rtol=1e-4), "f32 mismatch vs reference"

    # 2) Default bf16-compute / f32-accumulate path (v5e/v6e/v7x MXU-friendly).
    fwd_bf16 = jax.jit(autoencoder_forward)
    out_bf16 = jax.block_until_ready(fwd_bf16(x, params))
    assert out_bf16.shape == (batch, input_dim)
    assert jnp.allclose(out_bf16, ref, atol=5e-2, rtol=5e-2), "bf16 mismatch vs reference"

    # 3) Larger batch exercising a multi-step, megacore-parallel grid (grid=(2,)).
    x_big = jax.random.normal(k_x, (256, input_dim), dtype=jnp.float32)
    fwd_big = jax.jit(functools.partial(autoencoder_forward, batch_tile=128,
                                        compute_dtype=jnp.float32))
    out_big = jax.block_until_ready(fwd_big(x_big, params))
    ref_big = reference_forward(x_big, params)
    assert out_big.shape == x_big.shape
    assert jnp.allclose(out_big, ref_big, atol=1e-4, rtol=1e-4), "tiled mismatch vs reference"

    print("KERNEL_OK")
</pallas_src>

<mosaic_0001>
module attributes {stable_mosaic.version = 11 : i64} {
  func.func @autoencoder_fused_kernel(%arg0: i32, %arg1: memref<8x128xf32, #tpu.memory_space<vmem>>, %arg2: memref<128x128xf32, #tpu.memory_space<vmem>>, %arg3: memref<1x128xf32, #tpu.memory_space<vmem>>, %arg4: memref<128x128xf32, #tpu.memory_space<vmem>>, %arg5: memref<1x128xf32, #tpu.memory_space<vmem>>, %arg6: memref<8x128xf32, #tpu.memory_space<vmem>>) attributes {dimension_semantics = [#tpu.dimension_semantics<parallel>], iteration_bounds = array<i64: 1>, scalar_prefetch = 0 : i64, scratch_operands = 0 : i64, tpu.core_type = #tpu.core_type<tc>, window_params = [{transform_indices = @transform_0, window_bounds = array<i64: 8, 128>}, {pipeline_mode = #tpu.pipeline_mode<synchronous>, transform_indices = @transform_1, window_bounds = array<i64: 128, 128>}, {pipeline_mode = #tpu.pipeline_mode<synchronous>, transform_indices = @transform_2, window_bounds = array<i64: 1, 128>}, {pipeline_mode = #tpu.pipeline_mode<synchronous>, transform_indices = @transform_3, window_bounds = array<i64: 128, 128>}, {pipeline_mode = #tpu.pipeline_mode<synchronous>, transform_indices = @transform_4, window_bounds = array<i64: 1, 128>}, {transform_indices = @transform_5, window_bounds = array<i64: 8, 128>}]} {
    %c0 = arith.constant 0 : index
    %c0_0 = arith.constant 0 : index
    %0 = vector.load %arg1[%c0, %c0_0] : memref<8x128xf32, #tpu.memory_space<vmem>>, vector<8x128xf32>
    %c0_1 = arith.constant 0 : index
    %c0_2 = arith.constant 0 : index
    %1 = vector.load %arg2[%c0_1, %c0_2] : memref<128x128xf32, #tpu.memory_space<vmem>>, vector<128x128xf32>
    %cst = arith.constant dense<0.000000e+00> : vector<8x128xf32>
    %2 = tpu.matmul %0, %1, %cst {dimension_numbers = #tpu.dot_dimension_numbers<[1], [0], [0], [1], [0, 0, 1, 1], [], []>} : vector<8x128xf32>, vector<128x128xf32>, vector<8x128xf32> -> vector<8x128xf32>
    %c0_3 = arith.constant 0 : index
    %c0_4 = arith.constant 0 : index
    %3 = vector.load %arg3[%c0_3, %c0_4] : memref<1x128xf32, #tpu.memory_space<vmem>>, vector<1x128xf32>
    %4 = vector.broadcast %3 : vector<1x128xf32> to vector<8x128xf32>
    %5 = arith.addf %2, %4 : vector<8x128xf32>
    %cst_5 = arith.constant 0.000000e+00 : f32
    %6 = vector.broadcast %cst_5 : f32 to vector<8x128xf32>
    %7 = arith.maximumf %5, %6 : vector<8x128xf32>
    %c0_6 = arith.constant 0 : index
    %c0_7 = arith.constant 0 : index
    %8 = vector.load %arg4[%c0_6, %c0_7] : memref<128x128xf32, #tpu.memory_space<vmem>>, vector<128x128xf32>
    %cst_8 = arith.constant dense<0.000000e+00> : vector<8x128xf32>
    %9 = tpu.matmul %7, %8, %cst_8 {dimension_numbers = #tpu.dot_dimension_numbers<[1], [0], [0], [1], [0, 0, 1, 1], [], []>} : vector<8x128xf32>, vector<128x128xf32>, vector<8x128xf32> -> vector<8x128xf32>
    %c0_9 = arith.constant 0 : index
    %c0_10 = arith.constant 0 : index
    %10 = vector.load %arg5[%c0_9, %c0_10] : memref<1x128xf32, #tpu.memory_space<vmem>>, vector<1x128xf32>
    %11 = vector.broadcast %10 : vector<1x128xf32> to vector<8x128xf32>
    %12 = arith.addf %9, %11 : vector<8x128xf32>
    %c0_11 = arith.constant 0 : index
    %c0_12 = arith.constant 0 : index
    %13 = vector.load %arg6[%c0_11, %c0_12] : memref<8x128xf32, #tpu.memory_space<vmem>>, vector<8x128xf32>
    tpu.vector_store %arg6[%c0_11, %c0_12], %12 {strides = array<i32>} : memref<8x128xf32, #tpu.memory_space<vmem>>, vector<8x128xf32>,
    return
  }
  func.func @transform_0(%arg0: i32) -> (i32, i32) {
    %c0_i32 = arith.constant 0 : i32
    %c0_i32_0 = arith.constant 0 : i32
    return %arg0, %c0_i32 : i32, i32
  }
  func.func @transform_1(%arg0: i32) -> (i32, i32) {
    %c0_i32 = arith.constant 0 : i32
    %c0_i32_0 = arith.constant 0 : i32
    %c0_i32_1 = arith.constant 0 : i32
    return %c0_i32, %c0_i32_0 : i32, i32
  }
  func.func @transform_2(%arg0: i32) -> (i32, i32) {
    %c0_i32 = arith.constant 0 : i32
    %c0_i32_0 = arith.constant 0 : i32
    %c0_i32_1 = arith.constant 0 : i32
    return %c0_i32, %c0_i32_0 : i32, i32
  }
  func.func @transform_3(%arg0: i32) -> (i32, i32) {
    %c0_i32 = arith.constant 0 : i32
    %c0_i32_0 = arith.constant 0 : i32
    %c0_i32_1 = arith.constant 0 : i32
    return %c0_i32, %c0_i32_0 : i32, i32
  }
  func.func @transform_4(%arg0: i32) -> (i32, i32) {
    %c0_i32 = arith.constant 0 : i32
    %c0_i32_0 = arith.constant 0 : i32
    %c0_i32_1 = arith.constant 0 : i32
    return %c0_i32, %c0_i32_0 : i32, i32
  }
  func.func @transform_5(%arg0: i32) -> (i32, i32) {
    %c0_i32 = arith.constant 0 : i32
    %c0_i32_0 = arith.constant 0 : i32
    return %arg0, %c0_i32 : i32, i32
  }
}

</mosaic_0001>

<bundles_post_ra>
// kernel: autoencoder_forward.1
= control target key start
LH: loop header
LB: loop body
LE: loop exit
PB: predicated region body
PF: predicated region fallthrough
CT: control target
= control target key end

     0   :  { %s288_s0 = inlined_call_operand.vmem [shape: f32[8,128], index: 0, kind: input, shape index: {}]   ;;  %s289_s1 = inlined_call_operand.vmem [shape: f32[128,128], index: 1, kind: input, shape index: {}]   ;;  %s290_s2 = inlined_call_operand.vmem [shape: f32[1,128], index: 2, kind: input, shape index: {}]   ;;  %s291_s3 = inlined_call_operand.vmem [shape: f32[128,128], index: 3, kind: input, shape index: {}]   ;;  %s292_s4 = inlined_call_operand.vmem [shape: f32[1,128], index: 4, kind: input, shape index: {}]   ;;  %s293_s5 = inlined_call_operand.hbm [shape: f32[8,128], index: 5, kind: output, shape index: {}]  }
   0x1   :  { %v37_v0 = vld [vmem:[%s289_s1 + $0x78] sm:$0xff]  ;;  %v36_v1 = vld [vmem:[%s289_s1 + $0x70] sm:$0xff]  ;;  %v35_v2 = vld [vmem:[%s289_s1 + $0x68] sm:$0xff] }
   0x2   :  { %42 = vmatpush.msra.mxu0 %v37_v0  ;;  %v34_v3 = vld [vmem:[%s289_s1 + $0x60] sm:$0xff]  ;;  %v78_v4 = vld [vmem:[%s291_s3 + $0x78] sm:$0xff]  ;;  %v77_v6 = vld [vmem:[%s291_s3 + $0x70] sm:$0xff] }
   0x3   :  { %v33_v5 = vld [vmem:[%s289_s1 + $0x58] sm:$0xff]  ;;  %83 = vmatpush.msra.mxu1 %v78_v4  ;;  %v76_v7 = vld [vmem:[%s291_s3 + $0x68] sm:$0xff]  ;;  %v32_v8 = vld [vmem:[%s289_s1 + $0x50] sm:$0xff] }
   0x4   :  { %43 = vmatpush.msra.mxu0 %v36_v1  ;;  %v75_v9 = vld [vmem:[%s291_s3 + $0x60] sm:$0xff]  ;;  %v31_v10 = vld [vmem:[%s289_s1 + $0x48] sm:$0xff]  ;;  %v74_v11 = vld [vmem:[%s291_s3 + $0x58] sm:$0xff] }
   0x5   :  { %84 = vmatpush.msra.mxu1 %v77_v6 }
   0x6   :  { %44 = vmatpush.msra.mxu0 %v35_v2 }
   0x7   :  { %85 = vmatpush.msra.mxu1 %v76_v7 }
   0x8   :  { %45 = vmatpush.msra.mxu0 %v34_v3 }
   0xa   :  { %46 = vmatpush.msra.mxu0 %v33_v5 }
   0xc   :  { %47 = vmatpush.msra.mxu0 %v32_v8 }
   0xd   :  { %10 = vsyncpa [#allocation3], 0  ;;  %v30_v12 = vld [vmem:[%s289_s1 + $0x40] sm:$0xff]  ;;  %86 = vmatpush.msra.mxu1 %v75_v9  ;;  %v73_v13 = vld [vmem:[%s291_s3 + $0x50] sm:$0xff]  ;;  %s149_s11 = smov [#allocation2]   ;;  %s111_s15 = sshll.u32 %s293_s5, 4  ;;  %s112_s15 = int_to_ptr.hbm [resolvable:$true] %s111_s15 }
   0xe   :  { %48 = vmatpush.msra.mxu0 %v31_v10  ;;  %v29_v14 = vld [vmem:[%s289_s1 + $0x38] sm:$0xff]  ;;  %v72_v15 = vld [vmem:[%s291_s3 + $0x48] sm:$0xff]  ;;  %v28_v16 = vld [vmem:[%s289_s1 + $0x30] sm:$0xff]  ;;  %s109_s12 = sshll.u32 %s149_s11, 4  ;;  %s110_s12 = int_to_ptr.vmem [resolvable:$true] %s109_s12 }
   0xf   :  { %87 = vmatpush.msra.mxu1 %v74_v11  ;;  %v71_v17 = vld [vmem:[%s291_s3 + $0x40] sm:$0xff]  ;;  %v27_v18 = vld [vmem:[%s289_s1 + $0x28] sm:$0xff]  ;;  %v70_v19 = vld [vmem:[%s291_s3 + $0x38] sm:$0xff] }
  0x10   :  { %49 = vmatpush.msra.mxu0 %v30_v12  ;;  %v26_v20 = vld [vmem:[%s289_s1 + $0x20] sm:$0xff]  ;;  %v69_v21 = vld [vmem:[%s291_s3 + $0x30] sm:$0xff]  ;;  %v25_v22 = vld [vmem:[%s289_s1 + $0x18] sm:$0xff] }
  0x11   :  { %88 = vmatpush.msra.mxu1 %v73_v13  ;;  %v68_v23 = vld [vmem:[%s291_s3 + $0x28] sm:$0xff]  ;;  %v24_v24 = vld [vmem:[%s289_s1 + $0x10] sm:$0xff]  ;;  %v67_v25 = vld [vmem:[%s291_s3 + $0x20] sm:$0xff] }
  0x12   :  { %50 = vmatpush.msra.mxu0 %v29_v14  ;;  %v23_v26 = vld [vmem:[%s289_s1 + $0x8] sm:$0xff]  ;;  %v66_v27 = vld [vmem:[%s291_s3 + $0x18] sm:$0xff]  ;;  %v22_v28 = vld [vmem:[%s289_s1] sm:$0xff] }
  0x13   :  { %89 = vmatpush.msra.mxu1 %v72_v15  ;;  %v21_v29 = vld [vmem:[%s288_s0] sm:$0xff]  ;;  %v65_v30 = vld [vmem:[%s291_s3 + $0x10] sm:$0xff]  ;;  %v64_v31 = vld [vmem:[%s291_s3 + $0x8] sm:$0xff] }
  0x14   :  { %51 = vmatpush.msra.mxu0 %v28_v16  ;;  %v63_v32 = vld [vmem:[%s291_s3] sm:$0xff] }
  0x15   :  { %90 = vmatpush.msra.mxu1 %v71_v17  ;;  %v121_v33 = vld [vmem:[%s290_s2] ss:$0 sm:$0xff] }
  0x16   :  { %52 = vmatpush.msra.mxu0 %v27_v18  ;;  %v122_v37 = vld [vmem:[%s292_s4] ss:$0 sm:$0xff] }
  0x17   :  { %91 = vmatpush.msra.mxu1 %v70_v19 }
  0x18   :  { %53 = vmatpush.msra.mxu0 %v26_v20 }
  0x19   :  { %92 = vmatpush.msra.mxu1 %v69_v21 }
  0x1a   :  { %54 = vmatpush.msra.mxu0 %v25_v22 }
  0x1b   :  { %93 = vmatpush.msra.mxu1 %v68_v23 }
  0x1c   :  { %55 = vmatpush.msra.mxu0 %v24_v24 }
  0x1d   :  { %94 = vmatpush.msra.mxu1 %v67_v25 }
  0x1e   :  { %56 = vmatpush.msra.mxu0 %v23_v26 }
  0x1f   :  { %95 = vmatpush.msra.mxu1 %v66_v27 }
  0x20   :  { %57 = vmatpush.msra.mxu0 %v22_v28 }
  0x21   :  { %58 = vmatmul.f32.vlgmr.msra.gmra.mxu0 %v21_v29  ;;  %96 = vmatpush.msra.mxu1 %v65_v30 }
  0x23   :  { %97 = vmatpush.msra.mxu1 %v64_v31 }
  0x25   :  { %98 = vmatpush.msra.mxu1 %v63_v32 }
  0x9e   :  { %v59_v34 = vpop.f32.mrf.mxu0 }
  0x9f   :  { %v60_v35 = vadd.f32 %v121_v33, %v59_v34 }
  0xa1   :  { %v62_v36 = vmax.f32 %v60_v35, 0.0 }
  0xa3   :  { %99 = vmatmul.f32.vlgmr.msra.gmra.mxu1 %v62_v36 }
 0x120   :  { %v100_v38 = vpop.f32.mrf.mxu1 }
 0x121   :  { %v101_v39 = vadd.f32 %v122_v37, %v100_v38 }
 0x123   :  { %103 = vst [vmem:[#allocation2] sm:$0xff] %v101_v39 }
 0x124   :  { %114 = dma.vmem_to_hbm [thread:$0]  %s110_s12, 128, %s112_s15, [#allocation3]  }
 0x125   :  { %147 = dma.done.wait [#allocation3], 128  }
 0x126   :  { %148 = vsyncadd [#allocation3], 4294967168 }
 0x127   :  { %119 = vsyncpa [#allocation3], 1 }

</bundles_post_ra>
